<compile_context>
chip_gen: v5e
topology: v5e:2x2
jax: 0.10.0
libtpu: 0.0.40
codegen_flags: <defaults>
</compile_context>

<pallas_src>
import functools

import jax
import jax.numpy as jnp
from jax import lax
from jax.experimental import pallas as pl
from jax.experimental.pallas import tpu as pltpu


def _round_up(x, m):
    return ((x + m - 1) // m) * m


def _cdiv(a, b):
    return (a + b - 1) // b


def _conv_bn_lrelu_kernel(p_ref, w_ref, shift_ref, o_ref, acc_ref, *, neg_slope):
    """One (TILE_M x TK) @ (TK x LANES) MXU step, accumulated over the K grid axis.

    p_ref:     (TILE_M, TK)      bf16 im2col rows (one row per conv output row)
    w_ref:     (TK, LANES)       bf16 block-diagonal weights (BN scale folded in)
    shift_ref: (1, LANES)        f32 per-lane bias (conv bias + BN shift)
    o_ref:     (TILE_M, LANES)   bf16 output slab (lane-dense)
    acc_ref:   (TILE_M, LANES)   f32 accumulator scratch
    """
    k = pl.program_id(1)

    @pl.when(k == 0)
    def _():
        acc_ref[...] = jnp.zeros_like(acc_ref)

    acc_ref[...] += jnp.dot(p_ref[...], w_ref[...],
                            preferred_element_type=jnp.float32)

    @pl.when(k == pl.num_programs(1) - 1)
    def _():
        y = acc_ref[...] + shift_ref[...]
        # LeakyReLU(0.2): neg_slope < 1 so max(y, neg_slope*y) == lrelu(y).
        o_ref[...] = jnp.maximum(y, neg_slope * y).astype(o_ref.dtype)


def conv_layer_forward(x_nchw, weight_oihw, conv_bias, bn_gamma, bn_beta,
                       bn_mean, bn_var, *, stride, padding,
                       eps=1e-5, neg_slope=0.2, out_layout="NCHW"):
    n, c_in, h, w = x_nchw.shape
    c_out, _, kh, kw = weight_oihw.shape
    h_out = (h + 2 * padding - kh) // stride + 1
    w_out = (w + 2 * padding - kw) // stride + 1

    k_feat = kh * kw * c_in          # per-pixel patch features
    feat = w_out * k_feat            # per-output-row matmul K
    lanes = w_out * c_out            # per-output-row matmul N
    total_rows = n * h_out           # matmul M (batch folded in)

    # ---- wrapper-side layout plumbing in bf16 (NCHW -> NHWC, pad, im2col) ----
    x = jnp.transpose(x_nchw, (0, 2, 3, 1)).astype(jnp.bfloat16)
    x = jnp.pad(x, ((0, 0), (padding, padding), (padding, padding), (0, 0)))

    views = []
    for i in range(kh):
        for j in range(kw):
            views.append(x[:, i:i + (h_out - 1) * stride + 1:stride,
                              j:j + (w_out - 1) * stride + 1:stride, :])
    patches = jnp.stack(views, axis=3)                 # (N, Hout, Wout, KH*KW, Cin)
    patches = patches.reshape(total_rows, feat)        # bf16 im2col rows

    # ---- fold eval-mode BatchNorm into the weights / bias ----
    bn_scale = (bn_gamma / jnp.sqrt(bn_var + eps)).astype(jnp.float32)
    w_k = jnp.transpose(weight_oihw, (2, 3, 1, 0)).reshape(k_feat, c_out)
    w_k = w_k.astype(jnp.float32) * bn_scale[None, :]
    # Block-diagonal expansion over the Wout output columns -> lane-dense output.
    eye = jnp.eye(w_out, dtype=jnp.float32)
    w_bd = jnp.einsum('vw,kc->vkwc', eye, w_k).reshape(feat, lanes).astype(jnp.bfloat16)
    shift = ((conv_bias - bn_mean) * bn_scale + bn_beta).astype(jnp.float32)
    shift_row = jnp.tile(shift, w_out).reshape(1, lanes)

    # ---- pad lanes (N) to a multiple of 128: unmasked full-width stores ----
    lanes_p = _round_up(lanes, 128)
    if lanes_p != lanes:
        w_bd = jnp.pad(w_bd, ((0, 0), (0, lanes_p - lanes)))
        shift_row = jnp.pad(shift_row, ((0, 0), (0, lanes_p - lanes)))

    # ---- K tiling: pad feat to a multiple of 128 and split once it gets large ----
    TK_TARGET = 768
    feat_128 = _round_up(feat, 128)
    num_k = _cdiv(feat_128, TK_TARGET)
    tk = _round_up(_cdiv(feat_128, num_k), 128)
    feat_p = tk * num_k
    if feat_p != feat:
        patches = jnp.pad(patches, ((0, 0), (0, feat_p - feat)))
        w_bd = jnp.pad(w_bd, ((0, feat_p - feat), (0, 0)))

    # ---- M tiling: fixed multiple-of-16 tile, sized against a VMEM budget ----
    ALIGN_M = 16                       # bf16 sublane packing
    TILE_M_TARGET = 256
    VMEM_BUDGET = 24 * 1024 * 1024     # conservative per-step budget (v7x: 64 MiB VMEM)

    w_bufs = 1 if num_k == 1 else 2    # grid-invariant weight gets Buffered(1)

    def working_set(tm):
        patch_bytes = 2 * tm * tk * 2              # double-buffered bf16 patches
        weight_bytes = w_bufs * tk * lanes_p * 2   # bf16 block-diag weight
        out_bytes = 2 * tm * lanes_p * 2           # double-buffered bf16 output
        acc_bytes = tm * lanes_p * 4               # f32 accumulator scratch
        shift_bytes = lanes_p * 4                  # single-buffered f32 shift
        return patch_bytes + weight_bytes + out_bytes + acc_bytes + shift_bytes

    tile_rows = min(TILE_M_TARGET, _round_up(total_rows, ALIGN_M))
    while tile_rows > ALIGN_M and working_set(tile_rows) > VMEM_BUDGET:
        tile_rows = max(ALIGN_M, _round_up(tile_rows // 2, ALIGN_M))
    assert working_set(tile_rows) <= VMEM_BUDGET, (
        "weight/patch tiles do not fit the VMEM budget; reduce TK_TARGET")
    assert lanes_p % 128 == 0 and tk % 128 == 0 and tile_rows % ALIGN_M == 0

    num_m = _cdiv(total_rows, tile_rows)
    rows_p = num_m * tile_rows
    if rows_p != total_rows:
        patches = jnp.pad(patches, ((0, rows_p - total_rows), (0, 0)))

    vmem_limit = int(min(48 * 1024 * 1024,
                         max(2 * working_set(tile_rows), 16 * 1024 * 1024)))

    # ---- BlockSpecs ----
    patch_spec = pl.BlockSpec((tile_rows, tk), lambda i, k: (i, k))
    if num_k == 1:
        # Grid-invariant blocks: single buffer, fetched once.
        w_spec = pl.BlockSpec((tk, lanes_p), lambda i, k: (k, 0),
                              pipeline_mode=pl.Buffered(1))
    else:
        w_spec = pl.BlockSpec((tk, lanes_p), lambda i, k: (k, 0))
    shift_spec = pl.BlockSpec((1, lanes_p), lambda i, k: (0, 0),
                              pipeline_mode=pl.Buffered(1))
    out_spec = pl.BlockSpec((tile_rows, lanes_p), lambda i, k: (i, 0))

    kernel = functools.partial(_conv_bn_lrelu_kernel, neg_slope=neg_slope)

    out = pl.pallas_call(
        kernel,
        out_shape=jax.ShapeDtypeStruct((rows_p, lanes_p), jnp.bfloat16),
        grid_spec=pltpu.PrefetchScalarGridSpec(
            num_scalar_prefetch=0,
            grid=(num_m, num_k),
            in_specs=[patch_spec, w_spec, shift_spec],
            out_specs=out_spec,
            scratch_shapes=[pltpu.VMEM((tile_rows, lanes_p), jnp.float32)],
        ),
        compiler_params=pltpu.CompilerParams(
            dimension_semantics=("parallel", "arbitrary"),
            vmem_limit_bytes=vmem_limit),
    )(patches, w_bd, shift_row)

    # Strip row / lane padding; (N*Hout, Wout*Cout) -> NHWC.
    out_nhwc = out[:total_rows, :lanes].reshape(n, h_out, w_out, c_out)
    if out_layout == "NHWC":
        # Cheaper for downstream consumers: no extra HBM pass, stays bf16.
        return out_nhwc
    # Match the PyTorch module's NCHW / f32 output (transpose + cast fuse in XLA).
    return jnp.transpose(out_nhwc, (0, 3, 1, 2)).astype(jnp.float32)


def _reference_forward(x_nchw, weight_oihw, conv_bias, bn_gamma, bn_beta,
                       bn_mean, bn_var, *, stride, padding,
                       eps=1e-5, neg_slope=0.2):
    """Pure-JAX f32 reference (eval-mode module semantics) for validation."""
    y = lax.conv_general_dilated(
        x_nchw.astype(jnp.float32), weight_oihw.astype(jnp.float32),
        window_strides=(stride, stride),
        padding=[(padding, padding), (padding, padding)],
        dimension_numbers=("NCHW", "OIHW", "NCHW"))
    y = y + conv_bias.reshape(1, -1, 1, 1)
    y = (y - bn_mean.reshape(1, -1, 1, 1)) / jnp.sqrt(bn_var.reshape(1, -1, 1, 1) + eps)
    y = y * bn_gamma.reshape(1, -1, 1, 1) + bn_beta.reshape(1, -1, 1, 1)
    return jnp.where(y >= 0, y, neg_slope * y)


def _run_case(key, *, batch, in_channel, out_channel, ksize, stride, padding,
              spatial, random_bn):
    k_x, k_w, k_b, k_g, k_be, k_m, k_v = jax.random.split(key, 7)

    x = jax.random.normal(k_x, (batch, in_channel, spatial, spatial), dtype=jnp.float32)

    fan_in = in_channel * ksize * ksize
    bound = 1.0 / jnp.sqrt(jnp.float32(fan_in))
    conv_w = jax.random.uniform(k_w, (out_channel, in_channel, ksize, ksize),
                                minval=-bound, maxval=bound, dtype=jnp.float32)
    conv_b = jax.random.uniform(k_b, (out_channel,),
                                minval=-bound, maxval=bound, dtype=jnp.float32)
    if random_bn:
        bn_gamma = jax.random.uniform(k_g, (out_channel,), minval=0.5, maxval=1.5)
        bn_beta = 0.1 * jax.random.normal(k_be, (out_channel,), dtype=jnp.float32)
        bn_mean = 0.1 * jax.random.normal(k_m, (out_channel,), dtype=jnp.float32)
        bn_var = jax.random.uniform(k_v, (out_channel,), minval=0.5, maxval=2.0)
    else:
        # BatchNorm2d defaults: gamma=1, beta=0, running_mean=0, running_var=1.
        bn_gamma = jnp.ones((out_channel,), jnp.float32)
        bn_beta = jnp.zeros((out_channel,), jnp.float32)
        bn_mean = jnp.zeros((out_channel,), jnp.float32)
        bn_var = jnp.ones((out_channel,), jnp.float32)

    out = conv_layer_forward(x, conv_w, conv_b, bn_gamma, bn_beta, bn_mean, bn_var,
                             stride=stride, padding=padding)
    out = jax.block_until_ready(out)

    ref = _reference_forward(x, conv_w, conv_b, bn_gamma, bn_beta, bn_mean, bn_var,
                             stride=stride, padding=padding)
    ref = jax.block_until_ready(ref)

    h_out = (spatial + 2 * padding - ksize) // stride + 1
    assert out.shape == (batch, out_channel, h_out, h_out)
    # bf16 MXU inputs with f32 accumulation -> bf16-appropriate tolerance.
    assert jnp.allclose(out, ref, rtol=2e-2, atol=2e-2), "mismatch vs JAX reference"


if __name__ == "__main__":
    key = jax.random.PRNGKey(0)
    k1, k2 = jax.random.split(key)

    # conv_layer(in_channel=4, out_channel=8, kernel=3, stride=1, padding=1), x = (2,4,16,16)
    _run_case(k1, batch=2, in_channel=4, out_channel=8, ksize=3, stride=1,
              padding=1, spatial=16, random_bn=False)

    # Slightly larger strided case with non-trivial BN stats: exercises the K-tiled
    # accumulate path (num_k > 1) and K/lane padding.
    _run_case(k2, batch=4, in_channel=8, out_channel=8, ksize=3, stride=2,
              padding=1, spatial=32, random_bn=True)

    print("KERNEL_OK")
</pallas_src>

<mosaic_0001>
module attributes {stable_mosaic.version = 11 : i64} {
  func.func @_conv_bn_lrelu_kernel(%arg0: i32, %arg1: i32, %arg2: memref<32x640xbf16, #tpu.memory_space<vmem>>, %arg3: memref<640x128xbf16, #tpu.memory_space<vmem>>, %arg4: memref<1x128xf32, #tpu.memory_space<vmem>>, %arg5: memref<32x128xbf16, #tpu.memory_space<vmem>>, %arg6: memref<32x128xf32, #tpu.memory_space<vmem>>) attributes {dimension_semantics = [#tpu.dimension_semantics<parallel>, #tpu.dimension_semantics<arbitrary>], iteration_bounds = array<i64: 1, 1>, scalar_prefetch = 0 : i64, scratch_operands = 1 : i64, tpu.core_type = #tpu.core_type<tc>, window_params = [{transform_indices = @transform_0, window_bounds = array<i64: 32, 640>}, {pipeline_mode = #tpu.pipeline_mode<synchronous>, transform_indices = @transform_1, window_bounds = array<i64: 640, 128>}, {pipeline_mode = #tpu.pipeline_mode<synchronous>, transform_indices = @transform_2, window_bounds = array<i64: 1, 128>}, {transform_indices = @transform_3, window_bounds = array<i64: 32, 128>}]} {
    %c0_i32 = arith.constant 0 : i32
    %0 = arith.cmpi eq, %arg1, %c0_i32 : i32
    %1 = arith.extui %0 : i1 to i32
    %c0_i32_0 = arith.constant 0 : i32
    %2 = arith.cmpi ne, %1, %c0_i32_0 : i32
    scf.if %2 {
      %cst_10 = arith.constant 0.000000e+00 : f32
      %12 = vector.broadcast %cst_10 : f32 to vector<32x128xf32>
      %c0_11 = arith.constant 0 : index
      %c0_12 = arith.constant 0 : index
      %13 = vector.load %arg6[%c0_11, %c0_12] : memref<32x128xf32, #tpu.memory_space<vmem>>, vector<32x128xf32>
      tpu.vector_store %arg6[%c0_11, %c0_12], %12 {strides = array<i32>} : memref<32x128xf32, #tpu.memory_space<vmem>>, vector<32x128xf32>,
    } else {
    }
    %c0 = arith.constant 0 : index
    %c0_1 = arith.constant 0 : index
    %3 = vector.load %arg6[%c0, %c0_1] : memref<32x128xf32, #tpu.memory_space<vmem>>, vector<32x128xf32>
    %c0_2 = arith.constant 0 : index
    %c0_3 = arith.constant 0 : index
    %4 = vector.load %arg2[%c0_2, %c0_3] : memref<32x640xbf16, #tpu.memory_space<vmem>>, vector<32x640xbf16>
    %c0_4 = arith.constant 0 : index
    %c0_5 = arith.constant 0 : index
    %5 = vector.load %arg3[%c0_4, %c0_5] : memref<640x128xbf16, #tpu.memory_space<vmem>>, vector<640x128xbf16>
    %cst = arith.constant dense<0.000000e+00> : vector<32x128xf32>
    %6 = tpu.matmul %4, %5, %cst {dimension_numbers = #tpu.dot_dimension_numbers<[1], [0], [0], [1], [0, 0, 1, 1], [], []>} : vector<32x640xbf16>, vector<640x128xbf16>, vector<32x128xf32> -> vector<32x128xf32>
    %7 = arith.addf %3, %6 : vector<32x128xf32>
    %c0_6 = arith.constant 0 : index
    %c0_7 = arith.constant 0 : index
    %8 = vector.load %arg6[%c0_6, %c0_7] : memref<32x128xf32, #tpu.memory_space<vmem>>, vector<32x128xf32>
    tpu.vector_store %arg6[%c0_6, %c0_7], %7 {strides = array<i32>} : memref<32x128xf32, #tpu.memory_space<vmem>>, vector<32x128xf32>,
    %c0_i32_8 = arith.constant 0 : i32
    %9 = arith.cmpi eq, %arg1, %c0_i32_8 : i32
    %10 = arith.extui %9 : i1 to i32
    %c0_i32_9 = arith.constant 0 : i32
    %11 = arith.cmpi ne, %10, %c0_i32_9 : i32
    scf.if %11 {
      %c0_10 = arith.constant 0 : index
      %c0_11 = arith.constant 0 : index
      %12 = vector.load %arg6[%c0_10, %c0_11] : memref<32x128xf32, #tpu.memory_space<vmem>>, vector<32x128xf32>
      %c0_12 = arith.constant 0 : index
      %c0_13 = arith.constant 0 : index
      %13 = vector.load %arg4[%c0_12, %c0_13] : memref<1x128xf32, #tpu.memory_space<vmem>>, vector<1x128xf32>
      %14 = vector.broadcast %13 : vector<1x128xf32> to vector<32x128xf32>
      %15 = arith.addf %12, %14 : vector<32x128xf32>
      %cst_14 = arith.constant 2.000000e-01 : f32
      %16 = vector.broadcast %cst_14 : f32 to vector<32x128xf32>
      %17 = arith.mulf %16, %15 : vector<32x128xf32>
      %18 = arith.maximumf %15, %17 : vector<32x128xf32>
      %19 = arith.truncf %18 : vector<32x128xf32> to vector<32x128xbf16>
      %c0_15 = arith.constant 0 : index
      %c0_16 = arith.constant 0 : index
      %20 = vector.load %arg5[%c0_15, %c0_16] : memref<32x128xbf16, #tpu.memory_space<vmem>>, vector<32x128xbf16>
      tpu.vector_store %arg5[%c0_15, %c0_16], %19 {strides = array<i32>} : memref<32x128xbf16, #tpu.memory_space<vmem>>, vector<32x128xbf16>,
    } else {
    }
    return
  }
  func.func @transform_0(%arg0: i32, %arg1: i32) -> (i32, i32) {
    %c0_i32 = arith.constant 0 : i32
    return %arg0, %arg1 : i32, i32
  }
  func.func @transform_1(%arg0: i32, %arg1: i32) -> (i32, i32) {
    %c0_i32 = arith.constant 0 : i32
    %c0_i32_0 = arith.constant 0 : i32
    return %arg1, %c0_i32 : i32, i32
  }
  func.func @transform_2(%arg0: i32, %arg1: i32) -> (i32, i32) {
    %c0_i32 = arith.constant 0 : i32
    %c0_i32_0 = arith.constant 0 : i32
    %c0_i32_1 = arith.constant 0 : i32
    return %c0_i32, %c0_i32_0 : i32, i32
  }
  func.func @transform_3(%arg0: i32, %arg1: i32) -> (i32, i32) {
    %c0_i32 = arith.constant 0 : i32
    %c0_i32_0 = arith.constant 0 : i32
    return %arg0, %c0_i32 : i32, i32
  }
}

</mosaic_0001>

<bundles_post_ra>
// kernel: tpu_custom_call.1
= control target key start
LH: loop header
LB: loop body
LE: loop exit
PB: predicated region body
PF: predicated region fallthrough
CT: control target
= control target key end

     0   :  { %8 = vsyncpa [#allocation4], 0  ;;  %s997_s0 = inlined_call_operand.hbm [shape: bf16[32,640], index: 0, kind: input, shape index: {}]   ;;  %s998_s1 = inlined_call_operand.hbm [shape: bf16[640,128], index: 1, kind: input, shape index: {}]   ;;  %s999_s2 = inlined_call_operand.vmem [shape: f32[1,128], index: 2, kind: input, shape index: {}]   ;;  %s1000_s3 = inlined_call_operand.hbm [shape: bf16[32,128], index: 3, kind: output, shape index: {}]  }
   0x1   :  { %9 = vsyncpa [#allocation7], 0 }
   0x2   :  { %10 = vsyncpa [#allocation5], 0  ;;  %s15_s14 = sshll.u32 %s997_s0, 4  ;;  %s952_s15 = smov [#allocation3]   ;;  %s16_s14 = int_to_ptr.hbm [resolvable:$true] %s15_s14 }
   0x3   :  { %s17_s16 = sshll.u32 %s952_s15, 4  ;;  %s28_s19 = sshll.u32 %s998_s1, 4  ;;  %s18_s16 = int_to_ptr.vmem [resolvable:$true] %s17_s16  ;;  %s29_s19 = int_to_ptr.hbm [resolvable:$true] %s28_s19 }
   0x4   :  { %s953_s20 = smov 320   ;;  %s954_s21 = smov 20  }
   0x5   :  { %23 = dma.hbm_to_vmem [thread:$0]  %s16_s14, 1280, %s18_s16, [#allocation4], %s953_s20, %s953_s20, %s954_s21  }
   0x6   :  { %s955_s22 = smov [#allocation6]   ;;  %s956_s24 = smov 64  }
   0x7   :  { %s30_s23 = sshll.u32 %s955_s22, 4  ;;  %s957_s25 = smov 4   ;;  %s31_s23 = int_to_ptr.vmem [resolvable:$true] %s30_s23 }
   0x8   :  { %36 = dma.hbm_to_vmem [thread:$0]  %s29_s19, 5120, %s31_s23, [#allocation7], %s956_s24, %s956_s24, %s957_s25  }
   0x9   :  { %946 = dma.done.wait [#allocation4], 1280  }
   0xa   :  { %947 = vsyncadd [#allocation4], 4294966016 }
   0xb   :  { %948 = dma.done.wait [#allocation7], 5120  }
   0xc   :  { %949 = vsyncadd [#allocation7], 4294962176  ;;  %v814_v0 = vld [vmem:[#allocation6 + $0x38] sm:$0xff]  ;;  %v813_v4 = vld [vmem:[#allocation6 + $0x30] sm:$0xff]  ;;  %s583_s29 = sshll.u32 %s1000_s3, 4  ;;  %s584_s29 = int_to_ptr.hbm [resolvable:$true] %s583_s29 }
   0xd   :  { %v822_v1 = vld [vmem:[#allocation6 + $0x78] sm:$0xff]  ;;  %443 = vmatpush.bf16.msra.mxu0 %v814_v0  ;;  %v821_v5 = vld [vmem:[#allocation6 + $0x70] sm:$0xff]  ;;  %v812_v8 = vld [vmem:[#allocation6 + $0x28] sm:$0xff] }
   0xe   :  { %v830_v2 = vld [vmem:[#allocation6 + $0xb8] sm:$0xff]  ;;  %462 = vmatpush.bf16.msra.mxu1 %v822_v1  ;;  %v829_v6 = vld [vmem:[#allocation6 + $0xb0] sm:$0xff]  ;;  %v820_v9 = vld [vmem:[#allocation6 + $0x68] sm:$0xff] }
   0xf   :  { %v838_v3 = vld [vmem:[#allocation6 + $0xf8] sm:$0xff]  ;;  %481 = vmatpush.bf16.msra.mxu2 %v830_v2  ;;  %v837_v7 = vld [vmem:[#allocation6 + $0xf0] sm:$0xff]  ;;  %v828_v10 = vld [vmem:[#allocation6 + $0xa8] sm:$0xff] }
  0x10   :  { %500 = vmatpush.bf16.msra.mxu3 %v838_v3  ;;  %v836_v11 = vld [vmem:[#allocation6 + $0xe8] sm:$0xff]  ;;  %v811_v12 = vld [vmem:[#allocation6 + $0x20] sm:$0xff]  ;;  %v810_v16 = vld [vmem:[#allocation6 + $0x18] sm:$0xff] }
  0x11   :  { %444 = vmatpush.bf16.msra.mxu0 %v813_v4  ;;  %v819_v13 = vld [vmem:[#allocation6 + $0x60] sm:$0xff]  ;;  %v818_v17 = vld [vmem:[#allocation6 + $0x58] sm:$0xff]  ;;  %v809_v20 = vld [vmem:[#allocation6 + $0x10] sm:$0xff] }
  0x12   :  { %463 = vmatpush.bf16.msra.mxu1 %v821_v5  ;;  %v827_v14 = vld [vmem:[#allocation6 + $0xa0] sm:$0xff]  ;;  %v826_v18 = vld [vmem:[#allocation6 + $0x98] sm:$0xff]  ;;  %v817_v21 = vld [vmem:[#allocation6 + $0x50] sm:$0xff] }
  0x13   :  { %482 = vmatpush.bf16.msra.mxu2 %v829_v6  ;;  %v835_v15 = vld [vmem:[#allocation6 + $0xe0] sm:$0xff]  ;;  %v834_v19 = vld [vmem:[#allocation6 + $0xd8] sm:$0xff]  ;;  %v825_v22 = vld [vmem:[#allocation6 + $0x90] sm:$0xff] }
  0x14   :  { %501 = vmatpush.bf16.msra.mxu3 %v837_v7  ;;  %v833_v23 = vld [vmem:[#allocation6 + $0xd0] sm:$0xff]  ;;  %v808_v24 = vld [vmem:[#allocation6 + $0x8] sm:$0xff]  ;;  %v807_v28 = vld [vmem:[#allocation6] sm:$0xff] }
  0x15   :  { %445 = vmatpush.bf16.msra.mxu0 %v812_v8  ;;  %v816_v25 = vld [vmem:[#allocation6 + $0x48] sm:$0xff]  ;;  %v815_v29 = vld [vmem:[#allocation6 + $0x40] sm:$0xff]  ;;  %v599_v32 = vld [vmem:[#allocation3] sm:$0xf] }
  0x16   :  { %464 = vmatpush.bf16.msra.mxu1 %v820_v9  ;;  %v824_v26 = vld [vmem:[#allocation6 + $0x88] sm:$0xff]  ;;  %v823_v30 = vld [vmem:[#allocation6 + $0x80] sm:$0xff]  ;;  %v797_v34 = vld [vmem:[#allocation3 + $0x4] sm:$0xf] }
  0x17   :  { %483 = vmatpush.bf16.msra.mxu2 %v828_v10  ;;  %v832_v27 = vld [vmem:[#allocation6 + $0xc8] sm:$0xff]  ;;  %v831_v31 = vld [vmem:[#allocation6 + $0xc0] sm:$0xff]  ;;  %v607_v36 = vld [vmem:[#allocation3 + $0x8] sm:$0xf] }
  0x18   :  { %502 = vmatpush.bf16.msra.mxu3 %v836_v11  ;;  %v799_v33 = vld [vmem:[#allocation3 + $0x10] sm:$0xf0]  ;;  %v601_v35 = vld [vmem:[#allocation3 + $0x14] sm:$0xf0]  ;;  %v800_v37 = vld [vmem:[#allocation3 + $0x18] sm:$0xf0] }
  0x19   :  { %446 = vmatpush.bf16.msra.mxu0 %v811_v12  ;;  %v798_v38 = vld [vmem:[#allocation3 + $0xc] sm:$0xf]  ;;  %v609_v39 = vld [vmem:[#allocation3 + $0x1c] sm:$0xf0]  ;;  %v600_v41 = vor.u32 %v799_v33, %v599_v32  ;;  %v604_v42 = vor.u32 %v797_v34, %v601_v35  ;;  %v608_v43 = vor.u32 %v800_v37, %v607_v36  ;;  %v844_v46 = vld [vmem:[#allocation6 + $0x128] sm:$0xff] }
  0x1a   :  { %465 = vmatpush.bf16.msra.mxu1 %v819_v13  ;;  %v846_v40 = vld [vmem:[#allocation6 + $0x138] sm:$0xff]  ;;  %v612_v44 = vor.u32 %v798_v38, %v609_v39  ;;  %v845_v45 = vld [vmem:[#allocation6 + $0x130] sm:$0xff]  ;;  %v843_v47 = vld [vmem:[#allocation6 + $0x120] sm:$0xff] }
  0x1b   :  { %484 = vmatpush.bf16.msra.mxu2 %v827_v14  ;;  %v619_v48 = vld [vmem:[#allocation3 + $0x28] sm:$0xf]  ;;  %v804_v49 = vld [vmem:[#allocation3 + $0x38] sm:$0xf0]  ;;  %v802_v50 = vld [vmem:[#allocation3 + $0x2c] sm:$0xf] }
  0x1c   :  { %503 = vmatpush.bf16.msra.mxu3 %v835_v15  ;;  %v621_v51 = vld [vmem:[#allocation3 + $0x3c] sm:$0xf0]  ;;  %v627_v52 = vld [vmem:[#allocation3 + $0x30] sm:$0xf]  ;;  %v805_v53 = vld [vmem:[#allocation3 + $0x40] sm:$0xf0]  ;;  %v620_v57 = vor.u32 %v804_v49, %v619_v48 }
  0x1d   :  { %447 = vmatpush.bf16.msra.mxu0 %v810_v16  ;;  %v803_v54 = vld [vmem:[#allocation3 + $0x34] sm:$0xf]  ;;  %v629_v55 = vld [vmem:[#allocation3 + $0x44] sm:$0xf0]  ;;  %v624_v58 = vor.u32 %v802_v50, %v621_v51  ;;  %v628_v59 = vor.u32 %v805_v53, %v627_v52  ;;  %v841_v61 = vld [vmem:[#allocation6 + $0x110] sm:$0xff] }
  0x1e   :  { %466 = vmatpush.bf16.msra.mxu1 %v818_v17  ;;  %v842_v56 = vld [vmem:[#allocation6 + $0x118] sm:$0xff]  ;;  %v632_v60 = vor.u32 %v803_v54, %v629_v55  ;;  %v840_v62 = vld [vmem:[#allocation6 + $0x108] sm:$0xff]  ;;  %v839_v63 = vld [vmem:[#allocation6 + $0x100] sm:$0xff] }
  0x1f   :  { %485 = vmatpush.bf16.msra.mxu2 %v826_v18  ;;  %v615_v0 = vld [vmem:[#allocation3 + $0x10] sm:$0xf]  ;;  %v801_v1 = vld [vmem:[#allocation3 + $0x20] sm:$0xf0]  ;;  %v635_v2 = vld [vmem:[#allocation3 + $0x38] sm:$0xf] }
  0x20   :  { %504 = vmatpush.bf16.msra.mxu3 %v834_v19  ;;  %v806_v3 = vld [vmem:[#allocation3 + $0x48] sm:$0xf0]  ;;  %v616_v4 = vor.u32 %v801_v1, %v615_v0  ;;  %v873_v34 = vld [vmem:[%s999_s2] ss:$0 sm:$0xff]  ;;  %s958_s2 = smov [#allocation8]  }
  0x21   :  { %448 = vmatpush.bf16.msra.mxu0 %v809_v20  ;;  %v636_v5 = vor.u32 %v806_v3, %v635_v2  ;;  %s581_s26 = sshll.u32 %s958_s2, 4  ;;  %s582_s26 = int_to_ptr.vmem [resolvable:$true] %s581_s26 }
  0x22   :  { %467 = vmatpush.bf16.msra.mxu1 %v817_v21 }
  0x23   :  { %486 = vmatpush.bf16.msra.mxu2 %v825_v22 }
  0x24   :  { %505 = vmatpush.bf16.msra.mxu3 %v833_v23 }
  0x25   :  { %449 = vmatpush.bf16.msra.mxu0 %v808_v24 }
  0x26   :  { %468 = vmatpush.bf16.msra.mxu1 %v816_v25 }
  0x27   :  { %487 = vmatpush.bf16.msra.mxu2 %v824_v26 }
  0x28   :  { %506 = vmatpush.bf16.msra.mxu3 %v832_v27 }
  0x29   :  { %450 = vmatpush.bf16.msra.mxu0 %v807_v28 }
  0x2a   :  { %469 = vmatpush.bf16.msra.mxu1 %v815_v29 }
  0x2b   :  { %488 = vmatpush.bf16.msra.mxu2 %v823_v30 }
  0x2c   :  { %507 = vmatpush.bf16.msra.mxu3 %v831_v31  ;;  %451 = vmatmul.bf16.vlgmr.msra.gmra.mxu0 %v600_v41 }
  0x2d   :  { %519 = vmatpush.bf16.msrb.mxu0 %v846_v40  ;;  %470 = vmatmul.bf16.vlgmr.msra.gmra.mxu1 %v604_v42 }
  0x2e   :  { %858 = vmatpush.bf16.msrb.mxu1 %v846_v40  ;;  %489 = vmatmul.bf16.vlgmr.msra.gmra.mxu2 %v608_v43 }
  0x2f   :  { %508 = vmatmul.bf16.vlgmr.msra.gmra.mxu3 %v612_v44 }
  0x31   :  { %520 = vmatpush.bf16.msrb.mxu0 %v845_v45 }
  0x32   :  { %859 = vmatpush.bf16.msrb.mxu1 %v845_v45 }
  0x35   :  { %521 = vmatpush.bf16.msrb.mxu0 %v844_v46 }
  0x36   :  { %860 = vmatpush.bf16.msrb.mxu1 %v844_v46 }
  0x39   :  { %522 = vmatpush.bf16.msrb.mxu0 %v843_v47 }
  0x3a   :  { %861 = vmatpush.bf16.msrb.mxu1 %v843_v47 }
  0x3c   :  { %456 = vmatmul.bf16.gmra.mxu0 %v620_v57 }
  0x3d   :  { %523 = vmatpush.bf16.msrb.mxu0 %v842_v56  ;;  %475 = vmatmul.bf16.gmra.mxu1 %v624_v58 }
  0x3e   :  { %862 = vmatpush.bf16.msrb.mxu1 %v842_v56  ;;  %494 = vmatmul.bf16.gmra.mxu2 %v628_v59 }
  0x3f   :  { %513 = vmatmul.bf16.gmra.mxu3 %v632_v60 }
  0x41   :  { %524 = vmatpush.bf16.msrb.mxu0 %v841_v61 }
  0x42   :  { %863 = vmatpush.bf16.msrb.mxu1 %v841_v61 }
  0x45   :  { %525 = vmatpush.bf16.msrb.mxu0 %v840_v62 }
  0x46   :  { %864 = vmatpush.bf16.msrb.mxu1 %v840_v62 }
  0x49   :  { %526 = vmatpush.bf16.msrb.mxu0 %v839_v63 }
  0x4a   :  { %865 = vmatpush.bf16.msrb.mxu1 %v839_v63 }
  0x4c   :  { %527 = vmatmul.bf16.vlgmr.msrb.gmra.mxu0 %v616_v4 }
  0x4d   :  { %532 = vmatmul.bf16.vlgmr.msrb.gmra.mxu1 %v636_v5 }
  0xa9   :  { %v452_v6 = vpop.f32.mrf.mxu0 }
  0xaa   :  { %v471_v7 = vpop.f32.mrf.mxu1 }
  0xab   :  { %v472_v19 = vadd.f32 %v471_v7, %v452_v6 }
  0xb1   :  { %v490_v8 = vpop.f32.mrf.mxu2  ;;  %v454_v10 = vpop.f32.mrf.mxu0 }
  0xb2   :  { %v509_v9 = vpop.f32.mrf.mxu3  ;;  %v473_v11 = vpop.f32.mrf.mxu1  ;;  %v491_v22 = vadd.f32 %v490_v8, %v472_v19 }
  0xb3   :  { %v474_v28 = vadd.f32 %v473_v11, %v454_v10 }
  0xb4   :  { %v510_v27 = vadd.f32 %v509_v9, %v491_v22 }
  0xb9   :  { %v492_v12 = vpop.f32.mrf.mxu2  ;;  %v457_v13 = vpop.f32.mrf.mxu0 }
  0xba   :  { %v476_v14 = vpop.f32.mrf.mxu1  ;;  %v511_v15 = vpop.f32.mrf.mxu3  ;;  %v493_v31 = vadd.f32 %v492_v12, %v474_v28 }
  0xbb   :  { %v477_v20 = vadd.f32 %v476_v14, %v457_v13 }
  0xbc   :  { %v512_v37 = vadd.f32 %v511_v15, %v493_v31 }
  0xc1   :  { %v495_v16 = vpop.f32.mrf.mxu2  ;;  %v459_v17 = vpop.f32.mrf.mxu0 }
  0xc2   :  { %v478_v18 = vpop.f32.mrf.mxu1  ;;  %v514_v21 = vpop.f32.mrf.mxu3  ;;  %v496_v23 = vadd.f32 %v495_v16, %v477_v20 }
  0xc3   :  { %v479_v30 = vadd.f32 %v478_v18, %v459_v17 }
  0xc4   :  { %v515_v29 = vadd.f32 %v514_v21, %v496_v23 }
  0xc9   :  { %v497_v24 = vpop.f32.mrf.mxu2  ;;  %v528_v25 = vpop.f32.mrf.mxu0 }
  0xca   :  { %v533_v26 = vpop.f32.mrf.mxu1  ;;  %v498_v32 = vadd.f32 %v497_v24, %v479_v30  ;;  %v529_v33 = vadd.f32 %v528_v25, %v510_v27  ;;  %v516_v36 = vpop.f32.mrf.mxu3 }
  0xcb   :  { %v534_v35 = vadd.f32 %v533_v26, %v515_v29 }
  0xcc   :  { %v517_v38 = vadd.f32 %v516_v36, %v498_v32  ;;  %v557_v39 = vadd.f32 %v873_v34, %v529_v33 }
  0xcd   :  { %v559_v40 = vadd.f32 %v873_v34, %v534_v35 }
  0xce   :  { %v561_v45 = vmul.f32 0.2, %v557_v39 }
  0xcf   :  { %v563_v46 = vmul.f32 0.2, %v559_v40 }
  0xd0   :  { %v565_v51 = vmax.f32 %v557_v39, %v561_v45 }
  0xd1   :  { %v530_v41 = vpop.f32.mrf.mxu0  ;;  %v567_v52 = vmax.f32 %v559_v40, %v563_v46 }
  0xd2   :  { %v535_v42 = vpop.f32.mrf.mxu1  ;;  %v531_v43 = vadd.f32 %v530_v41, %v512_v37 }
  0xd3   :  { %v536_v44 = vadd.f32 %v535_v42, %v517_v38 }
  0xd4   :  { %v558_v47 = vadd.f32 %v873_v34, %v531_v43 }
  0xd5   :  { %v560_v48 = vadd.f32 %v873_v34, %v536_v44 }
  0xd6   :  { %v562_v49 = vmul.f32 0.2, %v558_v47 }
  0xd7   :  { %v564_v50 = vmul.f32 0.2, %v560_v48 }
  0xd8   :  { %v566_v53 = vmax.f32 %v558_v47, %v562_v49 }
  0xd9   :  { %v568_v54 = vmax.f32 %v560_v48, %v564_v50 }
  0xda   :  { %v850_v55 = vpack.c.bf16 %v566_v53, %v565_v51 }
  0xdb   :  { %v855_v56 = vpack.c.bf16 %v568_v54, %v567_v52 }
  0xdc   :  { %851 = vst [vmem:[#allocation8] sm:$0xff] %v850_v55  }
  0xdd   :  { %857 = vst [vmem:[#allocation8 + $0x8] sm:$0xff] %v855_v56  }
  0xde   :  { %589 = dma.vmem_to_hbm [thread:$0]  %s582_s26, 256, %s584_s29, [#allocation5], %s956_s24, %s956_s24, %s957_s25  }
  0xdf   :  { %950 = dma.done.wait [#allocation5], 256  }
  0xe0   :  { %951 = vsyncadd [#allocation5], 4294967040 }
  0xe1   :  { %594 = vsyncpa [#allocation4], 1 }
  0xe2   :  { %595 = vsyncpa [#allocation7], 1 }
  0xe3   :  { %596 = vsyncpa [#allocation5], 1 }

</bundles_post_ra>
